<compile_context>
chip_gen: v7x
topology: tpu7x:2x2x1
jax: 0.10.0
libtpu: 0.0.40
codegen_flags: <defaults>
</compile_context>

<pallas_src>
import functools

import jax
import jax.numpy as jnp
from jax import lax
from jax.experimental import pallas as pl
from jax.experimental.pallas import tpu as pltpu


def _warp_kernel(src_ref, flow_ref, warped_ref, *, H, W, C, CB, T):
    # src_ref:    (1, C*H, W)  -- whole source image for this batch element
    # flow_ref:   (1, 2, T)    -- flow for this tile of output pixels (row, col)
    # warped_ref: (1, C, T)
    flow = flow_ref[0].astype(jnp.float32)                      # (2, T)

    # Flat pixel index of this tile (int32 iota; converted once to f32 -- exact
    # for any realistic image size < 2^24 pixels).
    g = (lax.broadcasted_iota(jnp.int32, (1, T), 1)
         + pl.program_id(1) * T).astype(jnp.float32)            # (1, T)
    # row/col split without an integer divide: (g + 0.5)/W is >= 0.5/W away from
    # every integer, so reciprocal-multiply rounding cannot flip the floor.
    row = jnp.floor((g + 0.5) * jnp.float32(1.0 / W))
    col = g - row * jnp.float32(W)

    # Sampling coordinates in pixel space (identity grid + flow).
    y = row + flow[0:1, :]
    x = col + flow[1:2, :]

    # Border padding == clamp; bilinear corner indices / weights.
    yc = jnp.clip(y, 0.0, float(H - 1))
    xc = jnp.clip(x, 0.0, float(W - 1))
    y0 = jnp.floor(yc)
    x0 = jnp.floor(xc)
    wy = yc - y0
    wx = xc - x0
    y1 = jnp.minimum(y0 + 1.0, float(H - 1))
    x1 = jnp.minimum(x0 + 1.0, float(W - 1))
    x0i = x0.astype(jnp.int32)
    x1i = x1.astype(jnp.int32)
    y0i = y0.astype(jnp.int32)
    y1i = y1.astype(jnp.int32)

    # Column (W-direction) one-hot-with-weights slab CW[w, p] and row slab RW[h, p].
    wi = lax.broadcasted_iota(jnp.int32, (W, T), 0)
    CW = jnp.where(wi == x0i, 1.0 - wx, 0.0) + jnp.where(wi == x1i, wx, 0.0)
    hi = lax.broadcasted_iota(jnp.int32, (H, T), 0)
    RW = jnp.where(hi == y0i, 1.0 - wy, 0.0) + jnp.where(hi == y1i, wy, 0.0)

    # Channel-blocked separable bilinear:
    #   horiz[c*H+h, p] = sum_w src[c,h,w] * CW[w,p]        (MXU)
    #   warped[c, p]    = sum_h horiz[c*H+h, p] * RW[h,p]   (VPU mul + sublane reduce)
    # Blocking over channels bounds the live `horiz` intermediate (v7x VMEM).
    for c0 in range(0, C, CB):
        cb = min(CB, C - c0)
        blk = src_ref[0, c0 * H:(c0 + cb) * H, :].astype(jnp.float32)   # (cb*H, W)
        horiz = jnp.dot(blk, CW, preferred_element_type=jnp.float32)    # (cb*H, T)
        if H % 8 == 0:
            h3 = horiz.reshape(cb, H, T)                                # layout-clean split
            out = jnp.sum(h3 * RW[None, :, :], axis=1)                  # (cb, T)
        else:
            # Rarely-taken fallback when the (cb, H, T) sublane split is not 8-aligned.
            rows = []
            for c in range(cb):
                hc = horiz[c * H:(c + 1) * H, :]
                rows.append(jnp.sum(hc * RW, axis=0, keepdims=True))
            out = jnp.concatenate(rows, axis=0)
        warped_ref[0, c0:c0 + cb, :] = out.astype(warped_ref.dtype)


def _round_up(x, m):
    return (x + m - 1) // m * m


def _channel_block(C, H, T, horiz_budget_bytes=2 << 20):
    """Channels per matmul block so the live (Cb*H, T) f32 intermediate stays small."""
    return max(1, min(C, horiz_budget_bytes // max(1, H * T * 4)))


def _pick_tile_pixels(P, C, H, W, itemsize, budget_bytes, max_tile_pixels):
    """Largest T (multiple of 128, <= max_tile_pixels and <= round_up(P,128)) whose
    per-tile VMEM footprint fits the budget.  Never returns a non-multiple of 128."""
    t_cap = max(128, min(_round_up(max_tile_pixels, 128), _round_up(P, 128)))
    fixed = 2 * (C * H * W * itemsize)              # src block (double-buffered)
    best = 128
    for t in range(128, t_cap + 1, 128):
        cb = _channel_block(C, H, t)
        per_pix = (2 * (2 * 4)                      # flow block (double-buffered, f32)
                   + 2 * (C * itemsize)             # warped block (double-buffered)
                   + (W + H + cb * H + 8) * 4)      # CW, RW, horiz + misc f32 temporaries
        if fixed + per_pix * t <= budget_bytes:
            best = t
    return best


def transformer_2d(src, flow, *, max_tile_pixels=2048):
    """Pallas equivalent of Transformer_2D.forward(src, flow) -> (warped, mask)."""
    B, C, H, W = src.shape
    assert flow.shape == (B, 2, H, W)
    P = H * W
    itemsize = jnp.dtype(src.dtype).itemsize

    # ---- mask: plain fused XLA elementwise on flow (cheaper than a kernel output
    # stream).  Pixel-space check == torch's normalized-coordinate check for H,W > 1
    # (torch divides by zero when H==1 or W==1; that degenerate case is not mirrored).
    grid_r = jnp.arange(H, dtype=jnp.float32)[:, None]
    grid_c = jnp.arange(W, dtype=jnp.float32)[None, :]
    yy = grid_r[None] + flow[:, 0]
    xx = grid_c[None] + flow[:, 1]
    mask = ((yy >= 0.0) & (yy <= float(H - 1))
            & (xx >= 0.0) & (xx <= float(W - 1)))[:, None]              # (B,1,H,W) bool

    # ---- generation-aware VMEM / tile policy (v7x: 64 MiB physical, v5e/v6e: 128 MiB).
    try:
        vmem_cap = int(getattr(pltpu.get_tpu_info(), "vmem_capacity_bytes", 64 << 20))
    except Exception:  # pragma: no cover - conservative fallback off-TPU / old jax
        vmem_cap = 64 << 20
    vmem_limit = min(int(vmem_cap * 0.75), 112 << 20)
    tile_budget = vmem_limit // 2

    T = _pick_tile_pixels(P, C, H, W, itemsize, tile_budget, max_tile_pixels)
    CB = _channel_block(C, H, T)
    num_tiles = int(pl.cdiv(P, T))
    # v7x megacore: keep B*num_tiles even (both TCs busy) when the extra padded
    # tile is cheap relative to the total work.
    if (B * num_tiles) % 2 == 1 and num_tiles >= 3:
        num_tiles += 1
    P_pad = num_tiles * T

    # Lane-dense / matmul-friendly layouts produced in the XLA wrapper (free):
    src2d = src.reshape(B, C * H, W)                 # matmul LHS layout
    flow_flat = flow.reshape(B, 2, P)                # lane-dense pixel axis
    if P_pad != P:
        flow_flat = jnp.pad(flow_flat, ((0, 0), (0, 0), (0, P_pad - P)))

    cost = pl.CostEstimate(
        flops=2 * B * C * H * W * P_pad,
        transcendentals=0,
        bytes_accessed=int(src2d.size * itemsize
                           + flow_flat.size * jnp.dtype(flow.dtype).itemsize
                           + B * C * P_pad * itemsize),
    )

    kernel = functools.partial(_warp_kernel, H=H, W=W, C=C, CB=CB, T=T)
    warped_flat = pl.pallas_call(
        kernel,
        out_shape=jax.ShapeDtypeStruct((B, C, P_pad), src.dtype),
        grid_spec=pltpu.PrefetchScalarGridSpec(
            num_scalar_prefetch=0,
            grid=(B, num_tiles),
            in_specs=[
                # src block only changes with the batch index, so it is not
                # re-DMAed across the tile axis.
                pl.BlockSpec((1, C * H, W), lambda b, t: (b, 0, 0)),
                pl.BlockSpec((1, 2, T), lambda b, t: (b, 0, t)),
            ],
            out_specs=pl.BlockSpec((1, C, T), lambda b, t: (b, 0, t)),
        ),
        compiler_params=pltpu.CompilerParams(
            dimension_semantics=("parallel", "parallel"),
            vmem_limit_bytes=vmem_limit,
        ),
        cost_estimate=cost,
    )(src2d, flow_flat)

    warped = warped_flat[:, :, :P].reshape(B, C, H, W)
    return warped, mask


def _reference(src, flow):
    """Pure-JAX reference of the same semantics (for validation)."""
    B, C, H, W = src.shape
    row = jnp.broadcast_to(jnp.arange(H, dtype=jnp.float32)[:, None], (H, W))
    col = jnp.broadcast_to(jnp.arange(W, dtype=jnp.float32)[None, :], (H, W))
    y = row[None] + flow[:, 0]
    x = col[None] + flow[:, 1]
    # Pixel-space bounds check (== torch's normalized [-1,1] check for H, W > 1).
    mask = ((y >= 0.0) & (y <= H - 1) & (x >= 0.0) & (x <= W - 1))[:, None]
    yc = jnp.clip(y, 0.0, H - 1)
    xc = jnp.clip(x, 0.0, W - 1)
    y0 = jnp.floor(yc)
    x0 = jnp.floor(xc)
    wy = yc - y0
    wx = xc - x0
    y0i = y0.astype(jnp.int32)
    x0i = x0.astype(jnp.int32)
    y1i = jnp.minimum(y0i + 1, H - 1)
    x1i = jnp.minimum(x0i + 1, W - 1)

    def gather(yi, xi):
        idx = (yi * W + xi).reshape(B, 1, H * W)
        sf = src.reshape(B, C, H * W)
        return jnp.take_along_axis(sf, idx, axis=2).reshape(B, C, H, W)

    out = (((1 - wy) * (1 - wx))[:, None] * gather(y0i, x0i)
           + ((1 - wy) * wx)[:, None] * gather(y0i, x1i)
           + (wy * (1 - wx))[:, None] * gather(y1i, x0i)
           + (wy * wx)[:, None] * gather(y1i, x1i))
    return out, mask


def _check(src, flow, **kwargs):
    warped, mask = transformer_2d(src, flow, **kwargs)
    jax.block_until_ready(warped)
    jax.block_until_ready(mask)
    warped_ref, mask_ref = _reference(src, flow)
    assert warped.shape == src.shape and mask.shape == (src.shape[0], 1) + src.shape[2:]
    assert jnp.allclose(warped, warped_ref, atol=1e-4, rtol=1e-4)
    assert bool(jnp.all(mask == mask_ref))


if __name__ == "__main__":
    key = jax.random.PRNGKey(0)
    k1, k2, k3, k4 = jax.random.split(key, 4)

    # Case 1: canonical small shape, single pixel tile.
    B, C, H, W = 2, 4, 16, 16
    src = jax.random.normal(k1, (B, C, H, W), dtype=jnp.float32)
    flow = 3.0 * jax.random.normal(k2, (B, 2, H, W), dtype=jnp.float32)
    _check(src, flow)

    # Case 2: P not a multiple of 128 + forced small tile -> exercises padding,
    # multi-tile grid and the even-tile-count (megacore) bump.
    B2, C2, H2, W2 = 1, 3, 16, 20
    src2 = jax.random.normal(k3, (B2, C2, H2, W2), dtype=jnp.float32)
    flow2 = 2.0 * jax.random.normal(k4, (B2, 2, H2, W2), dtype=jnp.float32)
    _check(src2, flow2, max_tile_pixels=128)

    print("KERNEL_OK")
</pallas_src>

<mosaic_0001>
module attributes {stable_mosaic.version = 11 : i64} {
  func.func @_warp_kernel(%arg0: i32, %arg1: i32, %arg2: memref<1x64x16xf32, #tpu.memory_space<vmem>>, %arg3: memref<1x2x256xf32, #tpu.memory_space<vmem>>, %arg4: memref<1x4x256xf32, #tpu.memory_space<vmem>>) attributes {dimension_semantics = [#tpu.dimension_semantics<parallel>, #tpu.dimension_semantics<parallel>], iteration_bounds = array<i64: 2, 1>, scalar_prefetch = 0 : i64, scratch_operands = 0 : i64, tpu.core_type = #tpu.core_type<tc>, window_params = [{transform_indices = @transform_0, window_bounds = array<i64: 1, 64, 16>}, {transform_indices = @transform_1, window_bounds = array<i64: 1, 2, 256>}, {transform_indices = @transform_2, window_bounds = array<i64: 1, 4, 256>}]} {
    %c0 = arith.constant 0 : index
    %c0_0 = arith.constant 0 : index
    %c0_1 = arith.constant 0 : index
    %0 = vector.load %arg3[%c0, %c0_0, %c0_1] : memref<1x2x256xf32, #tpu.memory_space<vmem>>, vector<1x2x256xf32>
    %1 = vector.shape_cast %0 : vector<1x2x256xf32> to vector<2x256xf32>
    %2 = tpu.iota {dimensions = array<i32: 1>} : vector<1x256xi32>
    %c256_i32 = arith.constant 256 : i32
    %3 = arith.muli %arg1, %c256_i32 : i32
    %4 = vector.broadcast %3 : i32 to vector<1x256xi32>
    %5 = arith.addi %2, %4 : vector<1x256xi32>
    %6 = arith.sitofp %5 : vector<1x256xi32> to vector<1x256xf32>
    %cst = arith.constant 5.000000e-01 : f32
    %7 = vector.broadcast %cst : f32 to vector<1x256xf32>
    %8 = arith.addf %6, %7 : vector<1x256xf32>
    %cst_2 = arith.constant 6.250000e-02 : f32
    %9 = vector.broadcast %cst_2 : f32 to vector<1x256xf32>
    %10 = arith.mulf %8, %9 : vector<1x256xf32>
    %11 = math.floor %10 : vector<1x256xf32>
    %cst_3 = arith.constant 1.600000e+01 : f32
    %12 = vector.broadcast %cst_3 : f32 to vector<1x256xf32>
    %13 = arith.mulf %11, %12 : vector<1x256xf32>
    %14 = arith.subf %6, %13 : vector<1x256xf32>
    %15 = vector.extract_strided_slice %1 {offsets = [0, 0], sizes = [1, 256], strides = [1, 1]} : vector<2x256xf32> to vector<1x256xf32>
    %16 = arith.addf %11, %15 : vector<1x256xf32>
    %17 = vector.extract_strided_slice %1 {offsets = [1, 0], sizes = [1, 256], strides = [1, 1]} : vector<2x256xf32> to vector<1x256xf32>
    %18 = arith.addf %14, %17 : vector<1x256xf32>
    %cst_4 = arith.constant 0.000000e+00 : f32
    %cst_5 = arith.constant 1.500000e+01 : f32
    %19 = vector.broadcast %cst_4 : f32 to vector<1x256xf32>
    %20 = arith.maximumf %19, %16 : vector<1x256xf32>
    %21 = vector.broadcast %cst_5 : f32 to vector<1x256xf32>
    %22 = arith.minimumf %21, %20 : vector<1x256xf32>
    %cst_6 = arith.constant 0.000000e+00 : f32
    %cst_7 = arith.constant 1.500000e+01 : f32
    %23 = vector.broadcast %cst_6 : f32 to vector<1x256xf32>
    %24 = arith.maximumf %23, %18 : vector<1x256xf32>
    %25 = vector.broadcast %cst_7 : f32 to vector<1x256xf32>
    %26 = arith.minimumf %25, %24 : vector<1x256xf32>
    %27 = math.floor %22 : vector<1x256xf32>
    %28 = math.floor %26 : vector<1x256xf32>
    %29 = arith.subf %22, %27 : vector<1x256xf32>
    %30 = arith.subf %26, %28 : vector<1x256xf32>
    %cst_8 = arith.constant 1.000000e+00 : f32
    %31 = vector.broadcast %cst_8 : f32 to vector<1x256xf32>
    %32 = arith.addf %27, %31 : vector<1x256xf32>
    %cst_9 = arith.constant 1.500000e+01 : f32
    %33 = vector.broadcast %cst_9 : f32 to vector<1x256xf32>
    %34 = arith.minimumf %32, %33 : vector<1x256xf32>
    %cst_10 = arith.constant 1.000000e+00 : f32
    %35 = vector.broadcast %cst_10 : f32 to vector<1x256xf32>
    %36 = arith.addf %28, %35 : vector<1x256xf32>
    %cst_11 = arith.constant 1.500000e+01 : f32
    %37 = vector.broadcast %cst_11 : f32 to vector<1x256xf32>
    %38 = arith.minimumf %36, %37 : vector<1x256xf32>
    %39 = arith.fptosi %28 : vector<1x256xf32> to vector<1x256xi32>
    %40 = arith.fptosi %38 : vector<1x256xf32> to vector<1x256xi32>
    %41 = arith.fptosi %27 : vector<1x256xf32> to vector<1x256xi32>
    %42 = arith.fptosi %34 : vector<1x256xf32> to vector<1x256xi32>
    %43 = tpu.iota {dimensions = array<i32: 0>} : vector<16x256xi32>
    %44 = vector.broadcast %39 : vector<1x256xi32> to vector<16x256xi32>
    %45 = arith.cmpi eq, %43, %44 : vector<16x256xi32>
    %cst_12 = arith.constant 1.000000e+00 : f32
    %46 = vector.broadcast %cst_12 : f32 to vector<1x256xf32>
    %47 = arith.subf %46, %30 : vector<1x256xf32>
    %cst_13 = arith.constant 0.000000e+00 : f32
    %48 = vector.shape_cast %47 : vector<1x256xf32> to vector<1x256xf32>
    %49 = vector.broadcast %48 : vector<1x256xf32> to vector<16x256xf32>
    %50 = vector.broadcast %cst_13 : f32 to vector<16x256xf32>
    %51 = arith.select %45, %49, %50 : vector<16x256xi1>, vector<16x256xf32>
    %52 = vector.broadcast %40 : vector<1x256xi32> to vector<16x256xi32>
    %53 = arith.cmpi eq, %43, %52 : vector<16x256xi32>
    %cst_14 = arith.constant 0.000000e+00 : f32
    %54 = vector.shape_cast %30 : vector<1x256xf32> to vector<1x256xf32>
    %55 = vector.broadcast %54 : vector<1x256xf32> to vector<16x256xf32>
    %56 = vector.broadcast %cst_14 : f32 to vector<16x256xf32>
    %57 = arith.select %53, %55, %56 : vector<16x256xi1>, vector<16x256xf32>
    %58 = arith.addf %51, %57 : vector<16x256xf32>
    %59 = tpu.iota {dimensions = array<i32: 0>} : vector<16x256xi32>
    %60 = vector.broadcast %41 : vector<1x256xi32> to vector<16x256xi32>
    %61 = arith.cmpi eq, %59, %60 : vector<16x256xi32>
    %cst_15 = arith.constant 1.000000e+00 : f32
    %62 = vector.broadcast %cst_15 : f32 to vector<1x256xf32>
    %63 = arith.subf %62, %29 : vector<1x256xf32>
    %cst_16 = arith.constant 0.000000e+00 : f32
    %64 = vector.shape_cast %63 : vector<1x256xf32> to vector<1x256xf32>
    %65 = vector.broadcast %64 : vector<1x256xf32> to vector<16x256xf32>
    %66 = vector.broadcast %cst_16 : f32 to vector<16x256xf32>
    %67 = arith.select %61, %65, %66 : vector<16x256xi1>, vector<16x256xf32>
    %68 = vector.broadcast %42 : vector<1x256xi32> to vector<16x256xi32>
    %69 = arith.cmpi eq, %59, %68 : vector<16x256xi32>
    %cst_17 = arith.constant 0.000000e+00 : f32
    %70 = vector.shape_cast %29 : vector<1x256xf32> to vector<1x256xf32>
    %71 = vector.broadcast %70 : vector<1x256xf32> to vector<16x256xf32>
    %72 = vector.broadcast %cst_17 : f32 to vector<16x256xf32>
    %73 = arith.select %69, %71, %72 : vector<16x256xi1>, vector<16x256xf32>
    %74 = arith.addf %67, %73 : vector<16x256xf32>
    %c0_18 = arith.constant 0 : index
    %c0_19 = arith.constant 0 : index
    %c0_20 = arith.constant 0 : index
    %75 = vector.load %arg2[%c0_18, %c0_19, %c0_20] : memref<1x64x16xf32, #tpu.memory_space<vmem>>, vector<1x64x16xf32>
    %76 = vector.shape_cast %75 : vector<1x64x16xf32> to vector<64x16xf32>
    %cst_21 = arith.constant dense<0.000000e+00> : vector<64x256xf32>
    %77 = tpu.matmul %76, %58, %cst_21 {dimension_numbers = #tpu.dot_dimension_numbers<[1], [0], [0], [1], [0, 0, 1, 1], [], []>} : vector<64x16xf32>, vector<16x256xf32>, vector<64x256xf32> -> vector<64x256xf32>
    %78 = vector.shape_cast %77 : vector<64x256xf32> to vector<4x16x256xf32>
    %79 = vector.shape_cast %74 : vector<16x256xf32> to vector<1x16x256xf32>
    %80 = vector.broadcast %79 : vector<1x16x256xf32> to vector<4x16x256xf32>
    %81 = arith.mulf %78, %80 : vector<4x16x256xf32>
    %cst_22 = arith.constant dense<0.000000e+00> : vector<4x256xf32>
    %82 = vector.multi_reduction <add>, %81, %cst_22 [1] : vector<4x16x256xf32> to vector<4x256xf32>
    %c0_23 = arith.constant 0 : index
    %c0_24 = arith.constant 0 : index
    %c0_25 = arith.constant 0 : index
    %83 = vector.load %arg4[%c0_23, %c0_24, %c0_25] : memref<1x4x256xf32, #tpu.memory_space<vmem>>, vector<1x4x256xf32>
    %84 = vector.shape_cast %83 : vector<1x4x256xf32> to vector<4x256xf32>
    %85 = vector.shape_cast %82 : vector<4x256xf32> to vector<1x4x256xf32>
    tpu.vector_store %arg4[%c0_23, %c0_24, %c0_25], %85 {strides = array<i32>} : memref<1x4x256xf32, #tpu.memory_space<vmem>>, vector<1x4x256xf32>,
    return
  }
  func.func @transform_0(%arg0: i32, %arg1: i32) -> (i32, i32, i32) {
    %c0_i32 = arith.constant 0 : i32
    %c0_i32_0 = arith.constant 0 : i32
    %c0_i32_1 = arith.constant 0 : i32
    return %arg0, %c0_i32, %c0_i32_0 : i32, i32, i32
  }
  func.func @transform_1(%arg0: i32, %arg1: i32) -> (i32, i32, i32) {
    %c0_i32 = arith.constant 0 : i32
    %c0_i32_0 = arith.constant 0 : i32
    return %arg0, %c0_i32, %arg1 : i32, i32, i32
  }
  func.func @transform_2(%arg0: i32, %arg1: i32) -> (i32, i32, i32) {
    %c0_i32 = arith.constant 0 : i32
    %c0_i32_0 = arith.constant 0 : i32
    return %arg0, %c0_i32, %arg1 : i32, i32, i32
  }
}

</mosaic_0001>

<bundles_post_ra>
// kernel: tpu_custom_call.1
= control target key start
LH: loop header
LB: loop body
LE: loop exit
PB: predicated region body
PF: predicated region fallthrough
CT: control target
= control target key end

     0   :  { %7 = vsyncpa [#allocation3], 0  ;;  %s1133_s0 = inlined_call_operand.vmem [shape: f32[2,64,16], index: 0, kind: input, shape index: {}]   ;;  %s1134_s1 = inlined_call_operand.vmem [shape: f32[2,2,256], index: 1, kind: input, shape index: {}]   ;;  %s1135_s2 = inlined_call_operand.hbm [shape: f32[2,4,256], index: 2, kind: output, shape index: {}]  }
   0x1   :  { %9 = vsyncpa [#allocation3 + $0x1], 0  ;;  %s934_s9 = smov 0   ;;  %s936_s10 = smov 0  }
   0x2   :  { %s938_s11 = smov 0   ;;  %s940_s12 = smov 0  }
   0x3   :  { %s942_s13 = smov 0   ;;  %s944_s14 = smov 0  }
   0x4 LB: > { %s733_s15 = sadd.s32 4294967295, %s915_s14   ;;  %s734_s16 = sadd.s32 4294967294, %s915_s14   ;;  %s915_s14 = sphi %s944_s14, %s15_s14   ;;  %s911_s13 = sphi %s942_s13, %s1142_s13   ;;  %s907_s12 = sphi %s940_s12, %s1141_s12   ;;  %s903_s11 = sphi %s938_s11, %s1140_s11   ;;  %s899_s10 = sphi %s936_s10, %s1139_s10   ;;  %s895_s9 = sphi %s934_s9, %s1138_s9  }
   0x5   : > { %s27_s17 = sadd.s32 1, %s911_s13  ;;  %s90_s18 = sadd.s32 1, %s903_s11 }
   0x6   : > { %p29_p0 = scmp.ge.s32.totalorder %s27_s17, 2  ;;  %p100_p1 = scmp.ne.s32.totalorder %s903_s11, %s899_s10 }
   0x7   : > { %p101_p2 = scmp.eq.s32.totalorder %s733_s15, 1  ;;  %p106_p3 = scmp.ne.s32.totalorder %s899_s10, %s895_s9 }
   0x8   : > { %s1144_s17 = smov (%p29_p0, %s27_s17), 0  ;;  %p107_p5 = scmp.eq.s32.totalorder %s734_s16, 1 }
   0x9   : > { %p974_p4 = por %p101_p2, %p100_p1  ;;  %s85_s20 = ssub.s32 %s911_s13, %s1144_s17 }
   0xa   : > { %p737_p6 = scmp.ge.s32.totalorder %s915_s14, 1  ;;  %p88_p7 = scmp.eq.s32.totalorder %s85_s20, 0 }
   0xb   : > { %p981_p8 = por %p107_p5, %p106_p3  ;;  %p146_p9 = scmp.lt.s32.totalorder %s915_s14, 3 }
   0xc   : > { %s987_s22 = scalar_select %p88_p7, %s903_s11, %s90_s18  }
   0xd   : > { %p147_p10 = pnand %p737_p6, %p146_p9 }
   0xe   : > { %p177_p11 = scmp.lt.s32.totalorder (!%p147_p10), %s907_s12, 1  ;;  %v194_v0 = vlaneseq (!%p147_p10)  ;;  %v917_v1 = vmov (!%p147_p10), 0.0   ;;  %vm389_vm8 = vcmask (!%p147_p10), 130048   ;;  %s174_s4 = sand.u32 (!%p147_p10), 1, %s899_s10  }
   0xf   : > { %150 = sbr.rel (%p147_p10) target bundleno = 325 (0x145), region = 28  ;;  %478 = vmatprep.mubr.f32.mxu0 (!%p147_p10), %v917_v1  ;;  %502 = vmatprep.mubr.f32.mxu1 (!%p147_p10), %v917_v1  ;;  %s738_s5 = sshll.u32 (!%p147_p10), %s174_s4, 3 }
  0x10   : > { %v195_v2 = vand.u32 (!%p147_p10), 127, %v194_v0  ;;  %v996_v4 = vshrl.u32 (!%p147_p10), %v194_v0, 7  ;;  %s758_s6 = sshll.u32 (!%p147_p10), %s907_s12, 7  ;;  %s176_s7 = scalar_lea.vmem (!%p147_p10), [#allocation2], %s738_s5 }
  0x11   : > { %s645_s8 = sshll.u32 (!%p147_p10), %s176_s7, 4  ;;  %s1086_s18 = scalar_lea.hbm (!%p147_p10), %s1135_s2, %s758_s6  ;;  %s1088_s8 = int_to_ptr.vmem [resolvable:$true] %s645_s8 }
  0x12   : > { %v196_v3 = vadd.s32 (!%p147_p10), 128, %v195_v2  ;;  %v201_v5 = vcvt.s32.f32 (!%p147_p10), %v195_v2  ;;  %v228_v10 = vsub.s32 (!%p147_p10), 1, %v996_v4  ;;  %v232_v13 = vsub.s32 (!%p147_p10), 3, %v996_v4  ;;  %s837_s20 = scalar_lea.vmem (!%p147_p10), %s1088_s8, 128 }
  0x13   : > { %v1018_v30 = vsub.s32 (!%p147_p10), 0, %v996_v4  ;;  %v1021_v37 = vadd.s32 (!%p147_p10), 8, %v996_v4  ;;  %p838_p12 = scmp.ne.s32.totalorder (!%p147_p10), %s1088_s8, %s837_s20 }
  0x14   : > { %v202_v6 = vcvt.s32.f32 (!%p147_p10), %v196_v3  ;;  %v203_v7 = vadd.f32 (!%p147_p10), 0.5, %v201_v5 }
  0x15   : > { %p839_p13 = pnand (!%p147_p10), %p838_p12, %p974_p4 }
  0x16   : > { %s993_s23 = scalar_select %p177_p11, %s907_s12, 1  ;;  %v204_v8 = vadd.f32 0.5, %v202_v6  ;;  %v1001_v9 = vmul.f32 0.0625, %v203_v7 }
  0x17   : > { %s629_s12 = scalar_lea.sflag [#allocation3], %s174_s4  ;;  %p840_p0 = pneg %p839_p13 }
  0x18   : > { %s757_s24 = sshll.u32 %s993_s23, 2  ;;  %v1006_v12 = vmul.f32 0.0625, %v204_v8  ;;  %v207_v14 = vfloor.f32 %v1001_v9  ;;  %s756_s28 = sshll.u32 %s993_s23, 6 }
  0x19   : > { %s190_s27 = scalar_lea.vmem %s1134_s1, %s757_s24  ;;  %s181_s3 = scalar_lea.vmem %s1133_s0, %s756_s28 }
  0x1a   : > { %v1004_v11 = vld [vmem:[%s190_s27] sm:$0xf]  ;;  %v208_v15 = vfloor.f32 %v1006_v12  ;;  %v209_v16 = vmul.f32 16.0, %v207_v14  ;;  %s918_s23 = smov [#allocation2]  }
  0x1b   : > { %v229_v17 = vrot.slane %v1004_v11, %v228_v10  ;;  %v233_v19 = vrot.slane %v1004_v11, %v232_v13  ;;  %v381_v8 = vld [vmem:[%s181_s3] sm:$0xff]  ;;  %v382_v13 = vld [vmem:[%s181_s3 + $0x8] sm:$0xff]  ;;  %s841_s24 = sshll.u32 %s918_s23, 4  ;;  %s842_s24 = int_to_ptr.vmem [resolvable:$false] %s841_s24 }
  0x1c   : > { %v210_v18 = vmul.f32 16.0, %v208_v15  ;;  %v211_v20 = vsub.f32 %v201_v5, %v209_v16  ;;  %v385_v10 = vld [vmem:[%s181_s3 + $0x20] sm:$0xff]  ;;  %v386_v16 = vld [vmem:[%s181_s3 + $0x28] sm:$0xff]  ;;  %s843_s25 = scalar_lea.vmem %s842_s24, 256  ;;  %p844_p1 = scmp.lt.s32.totalorder %s1088_s8, %s842_s24 }
  0x1d   : > { %p845_p2 = scmp.lt.s32.totalorder %s843_s25, %s837_s20 }
  0x1e   : > { %v212_v21 = vsub.f32 %v202_v6, %v210_v18  ;;  %v236_v22 = vadd.f32 %v229_v17, %v211_v20  ;;  %v383_v17 = vld [vmem:[%s181_s3 + $0x10] sm:$0xff]  ;;  %v388_v20 = vld [vmem:[%s181_s3 + $0x38] sm:$0xff] }
  0x1f   : > { %v387_v18 = vld [vmem:[%s181_s3 + $0x30] sm:$0xff]  ;;  %p846_p3 = por %p845_p2, %p844_p1 }
  0x20   : > { %v237_v23 = vadd.f32 %v233_v19, %v212_v21  ;;  %v242_v24 = vmax.f32 %v236_v22, 0.0  ;;  %v384_v19 = vld [vmem:[%s181_s3 + $0x18] sm:$0xff]  ;;  %v217_v21 = vrot.slane %v1004_v11, %v1018_v30  ;;  %v220_v22 = vsub.s32 2, %v996_v4 }
  0x21   : > { %p847_p5 = pnand %p846_p3, %p840_p0 }
  0x22   : > { %v243_v25 = vmax.f32 %v237_v23, 0.0  ;;  %v244_v26 = vmin.f32 %v242_v24, 15.0  ;;  %v224_v23 = vadd.f32 %v217_v21, %v207_v14  ;;  %v221_v24 = vrot.slane %v1004_v11, %v220_v22 }
  0x24   : > { %v245_v27 = vmin.f32 %v243_v25, 15.0  ;;  %v248_v28 = vfloor.f32 %v244_v26  ;;  %v238_v25 = vmax.f32 %v224_v23, 0.0 }
  0x26   : > { %v249_v29 = vfloor.f32 %v245_v27  ;;  %v252_v31 = vsub.f32 %v244_v26, %v248_v28  ;;  %v258_v32 = vadd.f32 1.0, %v248_v28  ;;  %v765_v33 = vtrunc.f32 %v248_v28 }
  0x27   : > { %v240_v26 = vmin.f32 %v238_v25, 15.0 }
  0x28   : > { %v253_v34 = vsub.f32 %v245_v27, %v249_v29  ;;  %v259_v35 = vadd.f32 1.0, %v249_v29  ;;  %v767_v36 = vtrunc.f32 %v249_v29  ;;  %v260_v38 = vmin.f32 %v258_v32, 15.0 }
  0x29   : > { %v766_v39 = vcvt.f32.s32 %v765_v33  ;;  %v285_v40 = vsub.f32 1.0, %v252_v31  ;;  %v314_v52 = vrot.slane %v252_v31, %v1018_v30  ;;  %v246_v28 = vfloor.f32 %v240_v26 }
  0x2a   : > { %v261_v41 = vmin.f32 %v259_v35, 15.0  ;;  %v768_v42 = vcvt.f32.s32 %v767_v36  ;;  %v286_v43 = vsub.f32 1.0, %v253_v34  ;;  %v769_v44 = vtrunc.f32 %v260_v38 }
  0x2b   : > { %v276_v45 = vrot.slane %v766_v39, %v1018_v30  ;;  %v290_v48 = vrot.slane %v285_v40, %v1018_v30  ;;  %v318_v53 = vrot.slane %v253_v34, %v1018_v30  ;;  %v254_v31 = vadd.f32 1.0, %v246_v28 }
  0x2c   : > { %v771_v46 = vtrunc.f32 %v261_v41  ;;  %v280_v47 = vrot.slane %v768_v42, %v1018_v30  ;;  %v294_v49 = vrot.slane %v286_v43, %v1018_v30  ;;  %v770_v50 = vcvt.f32.s32 %v769_v44 }
  0x2d   : > { %vm281_vm0 = vcmp.eq.s32.totalorder %v996_v4, %v276_v45  ;;  %vm283_vm1 = vcmp.eq.s32.totalorder %v1021_v37, %v276_v45  ;;  %v256_v33 = vmin.f32 %v254_v31, 15.0  ;;  %v773_v35 = vtrunc.f32 %v246_v28 }
  0x2e   : > { %v772_v51 = vcvt.f32.s32 %v771_v46  ;;  %vm282_vm2 = vcmp.eq.s32.totalorder %v996_v4, %v280_v47  ;;  %vm284_vm3 = vcmp.eq.s32.totalorder %v1021_v37, %v280_v47  ;;  %v302_v54 = vrot.slane %v770_v50, %v1018_v30 }
  0x2f   : > { %v295_v56 = vsel %vm281_vm0, %v290_v48, 0.0  ;;  %v297_v57 = vsel %vm283_vm1, %v290_v48, 0.0  ;;  %v296_v58 = vsel %vm282_vm2, %v294_v49, 0.0  ;;  %v298_v59 = vsel %vm284_vm3, %v294_v49, 0.0 }
  0x30   : > { %v306_v55 = vrot.slane %v772_v51, %v1018_v30  ;;  %vm307_vm4 = vcmp.eq.s32.totalorder %v996_v4, %v302_v54  ;;  %vm309_vm5 = vcmp.eq.s32.totalorder %v1021_v37, %v302_v54  ;;  %v777_v36 = vtrunc.f32 %v256_v33 }
  0x31   : > { %v319_v60 = vsel %vm307_vm4, %v314_v52, 0.0  ;;  %v321_v61 = vsel %vm309_vm5, %v314_v52, 0.0  ;;  %v250_v39 = vsub.f32 %v240_v26, %v246_v28  ;;  %v774_v9 = vcvt.f32.s32 %v773_v35 }
  0x32   : > { %vm308_vm6 = vcmp.eq.s32.totalorder %v996_v4, %v306_v55  ;;  %vm310_vm7 = vcmp.eq.s32.totalorder %v1021_v37, %v306_v55  ;;  %v323_v0 = vadd.f32 %v319_v60, %v295_v56  ;;  %v325_v2 = vadd.f32 %v321_v61, %v297_v57 }
  0x33   : > { %v320_v62 = vsel %vm308_vm6, %v318_v53, 0.0  ;;  %v322_v63 = vsel %vm310_vm7, %v318_v53, 0.0  ;;  %v778_v14 = vcvt.f32.s32 %v777_v36  ;;  %v339_v41 = vsub.f32 1.0, %v250_v39 }
  0x34   : > { %v324_v3 = vadd.f32 %v320_v62, %v296_v58  ;;  %v326_v5 = vadd.f32 %v322_v63, %v298_v59  ;;  %v761_v6 = vpack.c.bf16 %v325_v2, %v323_v0  ;;  %v330_v12 = vrot.slane %v774_v9, %v1018_v30 }
  0x35   : > { %v344_v45 = vrot.slane %v339_v41, %v1018_v30  ;;  %v368_v46 = vrot.slane %v250_v39, %v1018_v30  ;;  %vm612_vm1 = vcmask 1041409   ;;  %vm614_vm2 = vcmask 1045509  }
  0x36   : > { %v759_v7 = vpack.c.bf16 %v326_v5, %v324_v3  ;;  %vm335_vm9 = vcmp.eq.s32.totalorder %v996_v4, %v330_v12  ;;  %vm337_vm11 = vcmp.eq.s32.totalorder %v1021_v37, %v330_v12  ;;  %vm617_vm3 = vcmask 1042434  }
  0x37   : > { %v349_v50 = vsel %vm335_vm9, %v344_v45, 0.0  ;;  %v351_v55 = vsel %vm337_vm11, %v344_v45, 0.0  ;;  %vm619_vm4 = vcmask 1046534   ;;  %vm622_vm5 = vcmask 1043459  }
  0x38   : > { %760 = vmatprep.subr.bf16.mxu0 %v759_v7  ;;  %763 = vmatprep.subr.bf16.mxu1 %v759_v7  ;;  %vm624_vm6 = vcmask 1047559  }
  0x39   : > { %762 = vmatpush1.bf16.msra.mxu0 %v761_v6  ;;  %764 = vmatpush1.bf16.msra.mxu1 %v761_v6 }
  0x3c   : > { %743 = vmatmul.mubr.msk.f32.vlgmr.msra.gmra.mrb[0].mxu0 %vm389_vm8, %v381_v8  ;;  %747 = vmatmul.mubr.msk.f32.vlgmr.msra.gmra.mrb[0].mxu1 %vm389_vm8, %v385_v10 }
  0x3d   : > { %484 = vmatprep.mubr.f32.mxu0 %v917_v1  ;;  %508 = vmatprep.mubr.f32.mxu1 %v917_v1 }
  0x40   : > { %744 = vmatmul.mubr.msk.f32.gmra.mrb[2].mxu0 %vm389_vm8, %v382_v13  ;;  %748 = vmatmul.mubr.msk.f32.gmra.mrb[2].mxu1 %vm389_vm8, %v386_v16 }
  0x41   : > { %490 = vmatprep.mubr.f32.mxu0 %v917_v1  ;;  %514 = vmatprep.mubr.f32.mxu1 %v917_v1 }
  0x44   : > { %745 = vmatmul.mubr.msk.f32.gmra.mrb[4].mxu0 %vm389_vm8, %v383_v17  ;;  %749 = vmatmul.mubr.msk.f32.gmra.mrb[4].mxu1 %vm389_vm8, %v387_v18 }
  0x45   : > { %496 = vmatprep.mubr.f32.mxu0 %v917_v1  ;;  %520 = vmatprep.mubr.f32.mxu1 %v917_v1  ;;  %v225_v1 = vadd.f32 %v221_v24, %v208_v15  ;;  %v356_v15 = vrot.slane %v778_v14, %v1018_v30 }
  0x47   : > { %v239_v27 = vmax.f32 %v225_v1, 0.0  ;;  %vm361_vm10 = vcmp.eq.s32.totalorder %v996_v4, %v356_v15  ;;  %vm363_vm12 = vcmp.eq.s32.totalorder %v1021_v37, %v356_v15 }
  0x48   : > { %746 = vmatmul.mubr.msk.f32.gmra.mrb[6].mxu0 %vm389_vm8, %v384_v19  ;;  %750 = vmatmul.mubr.msk.f32.gmra.mrb[6].mxu1 %vm389_vm8, %v388_v20  ;;  %v373_v51 = vsel %vm361_vm10, %v368_v46, 0.0  ;;  %v375_v56 = vsel %vm363_vm12, %v368_v46, 0.0 }
  0x49   : > { %v241_v29 = vmin.f32 %v239_v27, 15.0  ;;  %v377_v54 = vadd.f32 %v373_v51, %v349_v50  ;;  %v379_v3 = vadd.f32 %v375_v56, %v351_v55 }
  0x4b   : > { %v247_v32 = vfloor.f32 %v241_v29 }
  0x4d   : > { %v255_v34 = vadd.f32 1.0, %v247_v32  ;;  %v775_v40 = vtrunc.f32 %v247_v32  ;;  %v251_v42 = vsub.f32 %v241_v29, %v247_v32 }
  0x4f   : > { %v257_v38 = vmin.f32 %v255_v34, 15.0  ;;  %v776_v43 = vcvt.f32.s32 %v775_v40  ;;  %v340_v47 = vsub.f32 1.0, %v251_v42  ;;  %v372_v53 = vrot.slane %v251_v42, %v1018_v30 }
  0x51   : > { %v779_v11 = vtrunc.f32 %v257_v38  ;;  %v334_v48 = vrot.slane %v776_v43, %v1018_v30  ;;  %v348_v52 = vrot.slane %v340_v47, %v1018_v30 }
  0x53   : > { %v780_v44 = vcvt.f32.s32 %v779_v11  ;;  %vm336_vm13 = vcmp.eq.s32.totalorder %v996_v4, %v334_v48  ;;  %vm338_vm15 = vcmp.eq.s32.totalorder %v1021_v37, %v334_v48 }
  0x54   : > { %v350_v57 = vsel %vm336_vm13, %v348_v52, 0.0  ;;  %v352_v59 = vsel %vm338_vm15, %v348_v52, 0.0 }
  0x55   : > { %v360_v49 = vrot.slane %v780_v44, %v1018_v30 }
  0x57   : > { %vm362_vm14 = vcmp.eq.s32.totalorder %v996_v4, %v360_v49  ;;  %vm364_vm0 = vcmp.eq.s32.totalorder %v1021_v37, %v360_v49 }
  0x58   : > { %v374_v58 = vsel %vm362_vm14, %v372_v53, 0.0  ;;  %v376_v60 = vsel %vm364_vm0, %v372_v53, 0.0 }
  0x59   : > { %v378_v5 = vadd.f32 %v374_v58, %v350_v57  ;;  %v380_v4 = vadd.f32 %v376_v60, %v352_v59 }
 0x10f   : > { %v480_v30 = vpop.f32.mrb[0].mxu0  ;;  %v504_v61 = vpop.f32.mrb[0].mxu1 }
 0x110   : > { %v527_v62 = vmul.f32 %v480_v30, %v377_v54  ;;  %v482_v63 = vpop.f32.mrb[1].mxu0  ;;  %v535_v0 = vmul.f32 %v504_v61, %v377_v54  ;;  %v506_v2 = vpop.f32.mrb[1].mxu1 }
 0x111   : > { %v536_v6 = vmul.f32 %v506_v2, %v378_v5  ;;  %v528_v17 = vmul.f32 %v482_v63, %v378_v5 }
 0x113   : > { %v486_v7 = vpop.f32.mrb[2].mxu0  ;;  %v510_v8 = vpop.f32.mrb[2].mxu1 }
 0x114   : > { %v529_v37 = vmul.f32 %v486_v7, %v379_v3  ;;  %v537_v10 = vmul.f32 %v510_v8, %v379_v3  ;;  %v488_v13 = vpop.f32.mrb[3].mxu0  ;;  %v512_v16 = vpop.f32.mrb[3].mxu1 }
 0x115   : > { %v530_v18 = vmul.f32 %v488_v13, %v380_v4  ;;  %v538_v19 = vmul.f32 %v512_v16, %v380_v4 }
 0x116   : > { %v543_v20 = vadd.f32 %v529_v37, %v527_v62  ;;  %v571_v21 = vadd.f32 %v537_v10, %v535_v0 }
 0x117   : > { %v550_v22 = vadd.f32 %v530_v18, %v528_v17  ;;  %v578_v23 = vadd.f32 %v538_v19, %v536_v6  ;;  %v492_v24 = vpop.f32.mrb[4].mxu0  ;;  %v516_v25 = vpop.f32.mrb[4].mxu1 }
 0x118   : > { %v544_v1 = vrot.slane %v543_v20, 4  ;;  %v572_v26 = vrot.slane %v571_v21, 4  ;;  %v531_v27 = vmul.f32 %v492_v24, %v377_v54  ;;  %v494_v28 = vpop.f32.mrb[5].mxu0  ;;  %v539_v29 = vmul.f32 %v516_v25, %v377_v54  ;;  %v518_v31 = vpop.f32.mrb[5].mxu1 }
 0x119   : > { %v551_v32 = vrot.slane %v550_v22, 4  ;;  %v579_v33 = vrot.slane %v578_v23, 4  ;;  %v532_v39 = vmul.f32 %v494_v28, %v378_v5  ;;  %v540_v9 = vmul.f32 %v518_v31, %v378_v5 }
 0x11a   : > { %v545_v34 = vadd.f32 %v544_v1, %v543_v20  ;;  %v573_v35 = vadd.f32 %v572_v26, %v571_v21 }
 0x11b   : > { %v552_v36 = vadd.f32 %v551_v32, %v550_v22  ;;  %v580_v38 = vadd.f32 %v579_v33, %v578_v23  ;;  %v498_v14 = vpop.f32.mrb[6].mxu0  ;;  %v522_v40 = vpop.f32.mrb[6].mxu1 }
 0x11c   : > { %v546_v11 = vrot.slane %v545_v34, 2  ;;  %v574_v41 = vrot.slane %v573_v35, 2  ;;  %v533_v12 = vmul.f32 %v498_v14, %v379_v3  ;;  %v541_v15 = vmul.f32 %v522_v40, %v379_v3  ;;  %v500_v42 = vpop.f32.mrb[7].mxu0  ;;  %v524_v43 = vpop.f32.mrb[7].mxu1 }
 0x11d   : > { %v553_v44 = vrot.slane %v552_v36, 2  ;;  %v581_v45 = vrot.slane %v580_v38, 2  ;;  %v534_v46 = vmul.f32 %v500_v42, %v380_v4  ;;  %v542_v47 = vmul.f32 %v524_v43, %v380_v4 }
 0x11e   : > { %v547_v48 = vadd.f32 %v546_v11, %v545_v34  ;;  %v575_v49 = vadd.f32 %v574_v41, %v573_v35  ;;  %v557_v50 = vadd.f32 %v533_v12, %v531_v27  ;;  %v585_v51 = vadd.f32 %v541_v15, %v539_v29 }
 0x11f   : > { %v554_v52 = vadd.f32 %v553_v44, %v552_v36  ;;  %v582_v53 = vadd.f32 %v581_v45, %v580_v38  ;;  %v564_v54 = vadd.f32 %v534_v46, %v532_v39  ;;  %v592_v55 = vadd.f32 %v542_v47, %v540_v9 }
 0x120   : > { %v548_v56 = vrot.slane %v547_v48, 1  ;;  %v576_v57 = vrot.slane %v575_v49, 1  ;;  %v558_v58 = vrot.slane %v557_v50, 4  ;;  %v586_v59 = vrot.slane %v585_v51, 4 }
 0x121   : > { %v555_v60 = vrot.slane %v554_v52, 1  ;;  %v583_v30 = vrot.slane %v582_v53, 1  ;;  %v565_v61 = vrot.slane %v564_v54, 4  ;;  %v593_v62 = vrot.slane %v592_v55, 4 }
 0x122   : > { %v549_v63 = vadd.f32 %v548_v56, %v547_v48  ;;  %v577_v0 = vadd.f32 %v576_v57, %v575_v49  ;;  %v559_v2 = vadd.f32 %v558_v58, %v557_v50  ;;  %v587_v3 = vadd.f32 %v586_v59, %v585_v51 }
 0x123   : > { %v556_v5 = vadd.f32 %v555_v60, %v554_v52  ;;  %v584_v4 = vadd.f32 %v583_v30, %v582_v53  ;;  %v566_v6 = vadd.f32 %v565_v61, %v564_v54  ;;  %v594_v7 = vadd.f32 %v593_v62, %v592_v55 }
 0x124   : > { %v560_v8 = vrot.slane %v559_v2, 2  ;;  %v588_v37 = vrot.slane %v587_v3, 2 }
 0x125   : > { %v607_v10 = vcombine.low %v549_v63, %v556_v5  ;;  %v609_v13 = vcombine.low %v577_v0, %v584_v4  ;;  %v567_v16 = vrot.slane %v566_v6, 2  ;;  %v595_v17 = vrot.slane %v594_v7, 2 }
 0x126   : > { %v561_v18 = vadd.f32 %v560_v8, %v559_v2  ;;  %v589_v19 = vadd.f32 %v588_v37, %v587_v3 }
 0x127   : > { %v568_v20 = vadd.f32 %v567_v16, %v566_v6  ;;  %v596_v21 = vadd.f32 %v595_v17, %v594_v7  ;;  %v616_v33 = vrot.slane %v609_v13, 6 }
 0x128   : > { %v562_v22 = vrot.slane %v561_v18, 1  ;;  %v590_v23 = vrot.slane %v589_v19, 1 }
 0x129   : > { %v569_v24 = vrot.slane %v568_v20, 1  ;;  %v597_v25 = vrot.slane %v596_v21, 1 }
 0x12a   : > { %v563_v1 = vadd.f32 %v562_v22, %v561_v18  ;;  %v591_v26 = vadd.f32 %v590_v23, %v589_v19 }
 0x12b   : > { %v570_v27 = vadd.f32 %v569_v24, %v568_v20  ;;  %v598_v28 = vadd.f32 %v597_v25, %v596_v21 }
 0x12d   : > { %v608_v29 = vcombine.low %v563_v1, %v570_v27  ;;  %v610_v31 = vcombine.low %v591_v26, %v598_v28 }
 0x12f   : > { %v611_v32 = vrot.slane %v608_v29, 7  ;;  %v621_v38 = vrot.slane %v610_v31, 5 }
 0x131   : > { %v613_v34 = vsel %vm612_vm1, %v611_v32, %v607_v10 }
 0x132   : > { %v615_v35 = vsel %vm614_vm2, %v611_v32, %v613_v34 }
 0x133   : > { %v618_v36 = vsel %vm617_vm3, %v616_v33, %v615_v35 }
 0x134   : > { %v620_v39 = vsel %vm619_vm4, %v616_v33, %v618_v36 }
 0x135   : > { %v623_v9 = vsel %vm622_vm5, %v621_v38, %v620_v39 }
 0x136   : > { %v625_v14 = vsel %vm624_vm6, %v621_v38, %v623_v9 }
 0x137   : > { %627 = vst [vmem:[%s176_s7] sm:$0xff] %v625_v14 }
 0x138   : > { %850 = shalt.err (!%p847_p5)
}
 0x139   : > { %s851_s26 = scalar_lea.hbm %s1086_s18, 128  ;;  %s855_s29 = scalar_lea.hbm %s1135_s2, 256 }
 0x13a   : > { %p852_p6 = scmp.ne.s32.totalorder %s1086_s18, %s851_s26  ;;  %p856_p10 = scmp.lt.u32.totalorder %s1086_s18, %s1135_s2 }
 0x13b   : > { %p857_p11 = scmp.lt.u32.totalorder %s855_s29, %s851_s26  ;;  %p859_p13 = scmp.lt.u32.totalorder %s851_s26, %s1086_s18 }
 0x13c   : > { %p853_p7 = pnand %p852_p6, %p974_p4 }
 0x13d   : > { %p858_p12 = por %p857_p11, %p856_p10 }
 0x13e   : > { %p854_p9 = pneg %p853_p7 }
 0x13f   : > { %p860_p0 = por %p859_p13, %p858_p12 }
 0x141   : > { %p861_p1 = pnand %p860_p0, %p854_p9 }
 0x143   : > { %864 = shalt.err (!%p861_p1)
}
 0x144   : > { %781 = dma.vmem_to_hbm [thread:$0]  (%p974_p4), %s1088_s8, 128, %s1086_s18, %s629_s12  }
 0x145 PF: > { %p787_p2 = scmp.ge.s32.totalorder %s915_s14, 2  ;;  %s657_s4 = sand.u32 1, %s895_s9  }
 0x146   : > { %s658_s5 = scalar_lea.sflag [#allocation3], %s657_s4 }
 0x147   : > { %p784_p3 = pnand %p787_p2, %p981_p8 }
 0x149   : > { %890 = dma.done.wait (!%p784_p3), %s658_s5, 128  }
 0x14a   : > { %892 = vsyncadd (!%p784_p3), %s658_s5, 4294967168  ;;  %s15_s14 = sadd.s32 1, %s915_s14   ;;  %s1138_s9 = smov %s899_s10 }
 0x14b   : > { %p12_p5 = scmp.ge.s32.totalorder %s15_s14, 4   ;;  %s1139_s10 = smov %s903_s11 }
 0x14c   : > { %s1140_s11 = smov %s987_s22  ;;  %s1141_s12 = smov %s911_s13 }
 0x14d   : > { %s1142_s13 = smov %s1144_s17  ;;  %14 = sbr.rel (!%p12_p5) target bundleno = 4 (0x4), region = 66 }
 0x154   :  { %663 = vsyncpa [#allocation3], 1 }
 0x155   :  { %665 = vsyncpa [#allocation3 + $0x1], 1 }

</bundles_post_ra>
